<compile_context>
chip_gen: v5e
topology: v5e:2x2
jax: 0.10.0
libtpu: 0.0.40
codegen_flags: <defaults>
</compile_context>

<pallas_src>
import jax
import jax.numpy as jnp
from jax.experimental import pallas as pl
from jax.experimental.pallas import tpu as pltpu

_TARGET_BLOCK_BYTES = 4 * 1024 * 1024   # per-block padded VMEM payload target
_VMEM_LIMIT_BYTES = 32 * 1024 * 1024    # 2 bufs x (in + out) x 4 MiB = 16 MiB << limit


def _shuffle_copy_kernel(x_ref, o_ref):
    # Both refs see (bn, tc, S, L): the singleton group / channel-group dims are squeezed
    # out via `None` block dims. The channel shuffle itself is done by the BlockSpec index
    # maps (DMA-level permutation); the body is a straight lane-dense copy.
    o_ref[...] = x_ref[...]


def _ceil_to(v, m):
    return -(-v // m) * m


def _spatial_factorization(hw):
    """Pick (S, L) with S*L == hw minimizing (8,128)-tile padding, preferring wide lanes."""
    best_key, best = None, (1, hw)
    for L in range(1, hw + 1):
        if hw % L:
            continue
        S = hw // L
        padded = _ceil_to(S, 8) * _ceil_to(L, 128)
        key = (padded - hw, -L)   # min padding waste, then max lane width
        if best_key is None or key < best_key:
            best_key, best = key, (S, L)
    return best


def _largest_divisor_within(n, cap):
    """Largest divisor of n that is <= cap (always >= 1)."""
    cap = max(1, min(n, cap))
    best = 1
    for d in range(1, n + 1):
        if n % d == 0 and d <= cap:
            best = d
    return best


def shuffle_block(x, groups):
    """ShuffleBlock.forward for an NCHW input (any dtype); bit-exact channel permutation."""
    N, C, H, W = x.shape
    g = int(groups)
    assert C % g == 0, "channels must be divisible by groups"
    cpg = C // g
    hw = H * W

    if g == 1 or cpg == 1 and g == C == 1:
        return x  # identity shuffle (g == 1)

    # Lane-dense spatial factorization of the (free, contiguous) spatial dim.
    S, L = _spatial_factorization(hw)

    # Padded per-(batch-elem, channel) slab size in VMEM (sublane packing per dtype width).
    itemsize = x.dtype.itemsize
    packing = max(1, 4 // itemsize)
    sublane = 8 * packing
    padded_slab = _ceil_to(S, sublane) * _ceil_to(L, 128) * itemsize

    # Channel tile carries most of the payload; batch tile tops it up.
    tc = _largest_divisor_within(cpg, _TARGET_BLOCK_BYTES // padded_slab)
    bn = _largest_divisor_within(N, _TARGET_BLOCK_BYTES // (tc * padded_slab))

    xv = x.reshape(N, g, cpg, S, L)
    grid = (N // bn, g, cpg // tc)

    def in_index_map(nb, i, jb):
        # input 5-D view (N, g, cpg, S, L): group i, channel-block jb.
        return (nb, i, jb, 0, 0)

    def out_index_map(nb, i, jb):
        # output 5-D view (N, cpg, g, S, L): channel-block jb, group i (the transpose).
        return (nb, jb, i, 0, 0)

    out5 = pl.pallas_call(
        _shuffle_copy_kernel,
        out_shape=jax.ShapeDtypeStruct((N, cpg, g, S, L), x.dtype),
        grid=grid,
        in_specs=[pl.BlockSpec((bn, None, tc, S, L), in_index_map)],
        out_specs=pl.BlockSpec((bn, tc, None, S, L), out_index_map),
        compiler_params=pltpu.CompilerParams(
            dimension_semantics=("parallel", "parallel", "parallel"),
            vmem_limit_bytes=_VMEM_LIMIT_BYTES,
        ),
        cost_estimate=pl.CostEstimate(
            flops=0,
            transcendentals=0,
            bytes_accessed=2 * x.size * itemsize,
        ),
    )(xv)

    # (N, cpg, g, S, L) row-major flatten -> channel index j*g + i, spatial index s*L + l:
    # exactly the PyTorch permute(0,2,1,3,4).reshape(N, C, H, W).
    return out5.reshape(N, C, H, W)


def reference_shuffle_block(x, groups):
    """Pure-JAX reference matching the PyTorch ShuffleBlock exactly."""
    N, C, H, W = x.shape
    g = groups
    return (x.reshape(N, g, C // g, H, W)
             .transpose(0, 2, 1, 3, 4)
             .reshape(N, C, H, W))


def _check(x, groups):
    out = jax.block_until_ready(shuffle_block(x, groups))
    ref = jax.block_until_ready(reference_shuffle_block(x, groups))
    assert out.shape == x.shape, (out.shape, x.shape)
    if not bool(jnp.array_equal(out, ref)):
        max_err = float(jnp.max(jnp.abs(out.astype(jnp.float32) - ref.astype(jnp.float32))))
        raise AssertionError(f"Pallas ShuffleBlock mismatch vs reference, max_err={max_err}")


if __name__ == "__main__":
    key = jax.random.PRNGKey(0)

    # Primary test shape (hw % 128 == 0 path).
    N, C, H, W = 2, 4, 16, 16
    groups = 2
    x = jax.random.normal(key, (N, C, H, W), jnp.float32)
    _check(x, groups)

    # Secondary test: non-128-multiple spatial size + odd batch (exercises the
    # lane-dense factorization fallback and the tiling heuristics).
    k2 = jax.random.PRNGKey(1)
    x2 = jax.random.normal(k2, (3, 6, 14, 14), jnp.float32)
    _check(x2, 3)

    print("KERNEL_OK")
</pallas_src>

<mosaic_0001>
module attributes {stable_mosaic.version = 11 : i64} {
  func.func @_shuffle_copy_kernel(%arg0: i32, %arg1: i32, %arg2: i32, %arg3: memref<2x1x2x2x128xf32, #tpu.memory_space<vmem>>, %arg4: memref<2x2x1x2x128xf32, #tpu.memory_space<vmem>>) attributes {dimension_semantics = [#tpu.dimension_semantics<parallel>, #tpu.dimension_semantics<parallel>, #tpu.dimension_semantics<parallel>], iteration_bounds = array<i64: 1, 2, 1>, scalar_prefetch = 0 : i64, scratch_operands = 0 : i64, tpu.core_type = #tpu.core_type<tc>, window_params = [{transform_indices = @transform_0, window_bounds = array<i64: 2, 1, 2, 2, 128>}, {transform_indices = @transform_1, window_bounds = array<i64: 2, 2, 1, 2, 128>}]} {
    %c0 = arith.constant 0 : index
    %c0_0 = arith.constant 0 : index
    %c0_1 = arith.constant 0 : index
    %c0_2 = arith.constant 0 : index
    %c0_3 = arith.constant 0 : index
    %0 = vector.load %arg3[%c0, %c0_0, %c0_1, %c0_2, %c0_3] : memref<2x1x2x2x128xf32, #tpu.memory_space<vmem>>, vector<2x1x2x2x128xf32>
    %1 = vector.shape_cast %0 : vector<2x1x2x2x128xf32> to vector<2x2x2x128xf32>
    %c0_4 = arith.constant 0 : index
    %c0_5 = arith.constant 0 : index
    %c0_6 = arith.constant 0 : index
    %c0_7 = arith.constant 0 : index
    %c0_8 = arith.constant 0 : index
    %2 = vector.load %arg4[%c0_4, %c0_5, %c0_6, %c0_7, %c0_8] : memref<2x2x1x2x128xf32, #tpu.memory_space<vmem>>, vector<2x2x1x2x128xf32>
    %3 = vector.shape_cast %2 : vector<2x2x1x2x128xf32> to vector<2x2x2x128xf32>
    %4 = vector.shape_cast %1 : vector<2x2x2x128xf32> to vector<2x2x1x2x128xf32>
    tpu.vector_store %arg4[%c0_4, %c0_5, %c0_6, %c0_7, %c0_8], %4 {strides = array<i32>} : memref<2x2x1x2x128xf32, #tpu.memory_space<vmem>>, vector<2x2x1x2x128xf32>,
    return
  }
  func.func @transform_0(%arg0: i32, %arg1: i32, %arg2: i32) -> (i32, i32, i32, i32, i32) {
    %c0_i32 = arith.constant 0 : i32
    %c0_i32_0 = arith.constant 0 : i32
    %c0_i32_1 = arith.constant 0 : i32
    return %arg0, %arg1, %arg2, %c0_i32, %c0_i32_0 : i32, i32, i32, i32, i32
  }
  func.func @transform_1(%arg0: i32, %arg1: i32, %arg2: i32) -> (i32, i32, i32, i32, i32) {
    %c0_i32 = arith.constant 0 : i32
    %c0_i32_0 = arith.constant 0 : i32
    %c0_i32_1 = arith.constant 0 : i32
    return %arg0, %arg2, %arg1, %c0_i32, %c0_i32_0 : i32, i32, i32, i32, i32
  }
}

</mosaic_0001>

<bundles_post_ra>
// kernel: tpu_custom_call.1
= control target key start
LH: loop header
LB: loop body
LE: loop exit
PB: predicated region body
PF: predicated region fallthrough
CT: control target
= control target key end

     0   :  { %6 = vsyncpa [#allocation3], 0  ;;  %s646_s0 = inlined_call_operand.hbm [shape: f32[2,2,2,2,128], index: 0, kind: input, shape index: {}]   ;;  %s647_s1 = inlined_call_operand.hbm [shape: f32[2,2,2,2,128], index: 1, kind: output, shape index: {}]  }
   0x1   :  { %8 = vsyncpa [#allocation3 + $0x1], 0 }
   0x2   :  { %9 = vsyncpa [#allocation4], 0 }
   0x3   :  { %11 = vsyncpa [#allocation4 + $0x1], 0  ;;  %s511_s6 = smov 0   ;;  %s513_s7 = smov 0  }
   0x4   :  { %s515_s8 = smov 0   ;;  %s517_s9 = smov 0  }
   0x5   :  { %s519_s10 = smov 0   ;;  %s521_s11 = smov 0  }
   0x6 LB: > { %s320_s12 = sadd.s32 4294967295, %s491_s11   ;;  %s321_s13 = sadd.s32 4294967294, %s491_s11   ;;  %s491_s11 = sphi %s521_s11, %s17_s11   ;;  %s487_s10 = sphi %s519_s10, %s656_s10   ;;  %s483_s9 = sphi %s517_s9, %s655_s9   ;;  %s479_s8 = sphi %s515_s8, %s654_s8   ;;  %s475_s7 = sphi %s513_s7, %s653_s7   ;;  %s471_s6 = sphi %s511_s6, %s652_s6  }
   0x7   : > { %s32_s14 = sadd.s32 1, %s487_s10  ;;  %s47_s15 = sadd.s32 1, %s479_s8 }
   0x8   : > { %p34_p0 = scmp.ge.s32.totalorder %s32_s14, 2  ;;  %p54_p1 = scmp.ne.s32.totalorder %s479_s8, %s475_s7 }
   0x9   : > { %p55_p2 = scmp.eq.s32.totalorder %s491_s11, 0  ;;  %p60_p3 = scmp.ne.s32.totalorder %s475_s7, %s471_s6 }
   0xa   : > { %s658_s14 = smov (%p34_p0, %s32_s14), 0  ;;  %p61_p5 = scmp.eq.s32.totalorder %s320_s12, 0 }
   0xb   : > { %p552_p4 = por %p55_p2, %p54_p1  ;;  %s41_s17 = ssub.s32 %s487_s10, %s658_s14 }
   0xc   : > { %p88_p6 = scmp.eq.s32.totalorder %s320_s12, 1  ;;  %p45_p7 = scmp.eq.s32.totalorder %s41_s17, 0 }
   0xd   : > { %p558_p8 = por %p61_p5, %p60_p3  ;;  %p94_p10 = scmp.eq.s32.totalorder %s321_s13, 1 }
   0xe   : > { %p562_p9 = por %p88_p6, %p54_p1  ;;  %p323_p12 = scmp.ge.s32.totalorder %s491_s11, 2 }
   0xf   : > { %s567_s20 = scalar_select %p45_p7, %s479_s8, %s47_s15  }
  0x10   : > { %p569_p11 = por %p94_p10, %p60_p3  ;;  %110 = sbr.rel (%p323_p12) target bundleno = 34 (0x22), region = 16 }
  0x15   : > { %s114_s22 = sand.u32 1, %s479_s8   ;;  %s336_s23 = sshll.u32 %s487_s10, 2 }
  0x16   : > { %s324_s24 = sshll.u32 %s114_s22, 3  ;;  %s128_s27 = scalar_lea.hbm %s646_s0, %s336_s23 }
  0x17   : > { %s337_s28 = scalar_select %p552_p4, [#allocation0], [#allocation8] }
  0x18   : > { %s141_s29 = sshll.u32 %s128_s27, 4  ;;  %s118_s30 = scalar_lea.vmem [#allocation2], %s324_s24  ;;  %s142_s29 = int_to_ptr.hbm [resolvable:$true] %s141_s29 }
  0x19   : > { %s143_s2 = sshll.u32 %s118_s30, 4  ;;  %s133_s3 = sld [smem:[%s337_s28]]   ;;  %s144_s2 = int_to_ptr.vmem [resolvable:$true] %s143_s2 }
  0x1a   : > { %s493_s4 = smov 128   ;;  %s494_s5 = smov 64  }
  0x1b   : > { %338 = sst [smem:[#allocation7]] (%p552_p4), %s493_s4  ;;  %s495_s12 = smov 2  }
  0x1c   : > { %339 = sst [smem:[#allocation7 + $0x1]] (%p552_p4), %s494_s5  ;;  %s496_s13 = smov 32  }
  0x1d   : > { %340 = sst [smem:[#allocation7 + $0x2]] (%p552_p4), %s495_s12  ;;  %s115_s23 = scalar_lea.sflag [#allocation3], %s114_s22 }
  0x1e   : > { %341 = sst [smem:[#allocation7 + $0x3]] (%p552_p4), %s496_s13  ;;  %s497_s24 = smov [#allocation6]  }
  0x1f   : > { %s327_s15 = sshll.u32 %s133_s3, 26  ;;  %342 = sst [smem:[#allocation7 + $0x4]] (%p552_p4), %s496_s13 }
  0x20   : > { %s328_s17 = sadd.s32 134217728, %s327_s15  ;;  %343 = sst [smem:[#allocation7 + $0x5]] (%p552_p4), %s495_s12 }
  0x21   : > { %344 = dma.general (%p552_p4), %s142_s29, 128, %s144_s2, %s115_s23, %s497_s24, [#allocation7], %s328_s17, 0  }
  0x22 PF: > { %p329_p13 = scmp.ge.s32.totalorder %s491_s11, 1  ;;  %p164_p0 = scmp.lt.s32.totalorder %s491_s11, 3 }
  0x24   : > { %p165_p1 = pnand %p329_p13, %p164_p0 }
  0x25   : > { %s600_s25 = sand.u32 (!%p165_p1), 1, %s475_s7  }
  0x26   : > { %168 = sbr.rel (%p165_p1) target bundleno = 61 (0x3d), region = 24  ;;  %s330_s26 = sshll.u32 (!%p165_p1), %s600_s25, 3 }
  0x27   : > { %s171_s27 = scalar_lea.sflag (!%p165_p1), [#allocation3], %s600_s25  ;;  %s174_s28 = scalar_lea.vmem (!%p165_p1), [#allocation2], %s330_s26 }
  0x2b   : > { %462 = dma.done.wait (%p558_p8), %s171_s27, 128  }
  0x2c   : > { %464 = vsyncadd (%p558_p8), %s171_s27, 4294967168  ;;  %s193_s16 = scalar_lea.vmem [#allocation5], %s330_s26  ;;  %s333_s29 = sshll.u32 %s483_s9, 1  ;;  %v198_v0 = vld [vmem:[%s174_s28] sm:$0xff]  }
  0x2d   : > { %s224_s22 = sshll.u32 %s193_s16, 4  ;;  %s223_s3 = scalar_lea.hbm %s647_s1, %s333_s29  ;;  %202 = vst [vmem:[%s193_s16] sm:$0xff] %v198_v0   ;;  %s225_s22 = int_to_ptr.vmem [resolvable:$true] %s224_s22 }
  0x2e   : > { %s226_s4 = sshll.u32 %s223_s3, 4  ;;  %s207_s5 = scalar_lea.sflag [#allocation4], %s600_s25  ;;  %s227_s4 = int_to_ptr.hbm [resolvable:$true] %s226_s4 }
  0x2f   : > { %s423_s12 = sshra.s32 %s227_s4, 4  ;;  %s429_s9 = scalar_lea.hbm %s647_s1, 16  ;;  %s424_s12 = int_to_ptr.hbm [resolvable:$true] %s423_s12 }
  0x30   : > { %s425_s18 = scalar_lea.hbm %s424_s12, 8  ;;  %p430_p5 = scmp.lt.s32.totalorder %s424_s12, %s647_s1 }
  0x31   : > { %p426_p2 = scmp.ne.s32.totalorder %s424_s12, %s425_s18  ;;  %p431_p6 = scmp.lt.s32.totalorder %s429_s9, %s425_s18 }
  0x33   : > { %p427_p3 = pnand %p426_p2, %p562_p9  ;;  %p432_p7 = por %p431_p6, %p430_p5 }
  0x35   : > { %p428_p4 = pneg %p427_p3 }
  0x37   : > { %p433_p8 = pnand %p432_p7, %p428_p4 }
  0x39   : > { %436 = shalt.err (!%p433_p8)
}
  0x3a   : > { %s498_s24 = smov 32   ;;  %s499_s25 = smov 64  }
  0x3b   : > { %s500_s26 = smov 2  }
  0x3c   : > { %346 = dma.vmem_to_hbm [thread:$0]  (%p562_p9), %s225_s22, 128, %s227_s4, %s207_s5, %s498_s24, %s499_s25, %s500_s26  }
  0x3d PF: > { %s241_s27 = sand.u32 1, %s471_s6   ;;  %p349_p10 = pnand %p323_p12, %p569_p11 }
  0x3e   : > { %s242_s28 = scalar_lea.sflag [#allocation4], %s241_s27 }
  0x3f   : > { %p350_p13 = pneg %p349_p10 }
  0x41   : > { %466 = dma.done.wait (%p350_p13), %s242_s28, 128  }
  0x42   : > { %468 = vsyncadd (%p350_p13), %s242_s28, 4294967168  ;;  %s17_s11 = sadd.s32 1, %s491_s11   ;;  %s652_s6 = smov %s475_s7 }
  0x43   : > { %p14_p0 = scmp.ge.s32.totalorder %s17_s11, 4   ;;  %s653_s7 = smov %s479_s8 }
  0x44   : > { %s654_s8 = smov %s567_s20  ;;  %s655_s9 = smov %s487_s10 }
  0x45   : > { %s656_s10 = smov %s658_s14  ;;  %16 = sbr.rel (!%p14_p0) target bundleno = 6 (0x6), region = 74 }
  0x4a   :  { %248 = vsyncpa [#allocation3], 1 }
  0x4b   :  { %250 = vsyncpa [#allocation3 + $0x1], 1 }
  0x4c   :  { %251 = vsyncpa [#allocation4], 1 }
  0x4d   :  { %253 = vsyncpa [#allocation4 + $0x1], 1 }

</bundles_post_ra>
